<compile_context>
chip_gen: v7x
topology: tpu7x:2x2x1
jax: 0.10.0
libtpu: 0.0.40
codegen_flags: <defaults>
</compile_context>

<pallas_src>
import functools
import math

import jax
import jax.numpy as jnp
from jax.experimental import pallas as pl
from jax.experimental.pallas import tpu as pltpu


def _rmsnorm_kernel(x_ref, scale_ref, o_ref, *, d_x, eps):
    # x_ref: (tile_rows, d)   scale_ref: (1, d)   o_ref: (tile_rows, d)
    d = x_ref.shape[-1]
    x = x_ref[...].astype(jnp.float32)
    xsq = x * x
    if d_x != d:
        # Partial RMSNorm: lane-mask the reduction instead of slicing columns,
        # so a non-128-aligned d_x never forces masked/realigned vector ops.
        col = jax.lax.broadcasted_iota(jnp.int32, (1, d), 1)
        xsq = jnp.where(col < d_x, xsq, 0.0)
    sumsq = jnp.sum(xsq, axis=-1, keepdims=True)            # (tile_rows, 1)
    rms = jnp.sqrt(sumsq) * (float(d_x) ** -0.5)
    denom = rms + eps
    # EUP approximate reciprocal + one Newton step -> full f32 precision while
    # keeping the per-row reciprocal off the VPU divide path.
    inv = pl.reciprocal(denom, approx=True)
    inv = inv * (2.0 - denom * inv)
    scale = scale_ref[...].astype(jnp.float32)               # (1, d)
    o_ref[...] = ((x * inv) * scale).astype(o_ref.dtype)


def _pick_tile_rows(rows, d, itemsize, sublane, *, block_budget_bytes, max_tile_rows):
    """Largest row tile whose 2x-in + 2x-out double-buffered blocks fit the budget."""
    by_vmem = block_budget_bytes // (4 * d * itemsize)
    tile = max(sublane, min(max_tile_rows, by_vmem))
    tile = (tile // sublane) * sublane
    rows_min = pl.cdiv(rows, sublane) * sublane
    tile = min(tile, rows_min)
    # Keep >= 2 grid steps when there are enough rows so both v7x TensorCores
    # get work under dimension_semantics=("parallel",).
    if rows_min >= 2 * sublane:
        half = pl.cdiv(pl.cdiv(rows_min, 2), sublane) * sublane
        tile = min(tile, half)
    return max(sublane, tile)


def rmsnorm_pallas(x, scale, *, p=-1.0, eps=1e-8,
                   block_budget_bytes=24 * 1024 * 1024,   # fits v7x's 64 MiB VMEM/TC
                   vmem_limit_bytes=48 * 1024 * 1024,     # raise above default scoped limit
                   max_tile_rows=1024):
    """RMSNorm over the last axis of x. x: (..., d), scale: (d,)."""
    d = x.shape[-1]
    if p < 0.0 or p > 1.0:
        d_x = d
    else:
        d_x = max(1, int(d * p))   # clamp: avoid d_x == 0 (division by zero) for tiny p

    lead_shape = x.shape[:-1]
    rows = math.prod(lead_shape)
    x2d = x.reshape(rows, d)
    scale2d = scale.reshape(1, d)

    sublane = 16 if x.dtype == jnp.bfloat16 else 8
    itemsize = jnp.dtype(x.dtype).itemsize
    tile_rows = _pick_tile_rows(rows, d, itemsize, sublane,
                                block_budget_bytes=block_budget_bytes,
                                max_tile_rows=max_tile_rows)

    grid_rows = pl.cdiv(rows, tile_rows)
    rows_padded = grid_rows * tile_rows
    if rows_padded != rows:
        # Zero rows normalize to zero (0 / eps) and are discarded after the call.
        x2d = jnp.pad(x2d, ((0, rows_padded - rows), (0, 0)))

    kernel = functools.partial(_rmsnorm_kernel, d_x=d_x, eps=eps)

    # TODO(synk): for d < 128 the output lane width forces masked stores; a
    # lane-dense repack (folding several rows into the lane axis) would help there.
    out2d = pl.pallas_call(
        kernel,
        out_shape=jax.ShapeDtypeStruct((rows_padded, d), x.dtype),
        grid=(grid_rows,),
        in_specs=[
            pl.BlockSpec((tile_rows, d), lambda i: (i, 0)),
            pl.BlockSpec((1, d), lambda i: (0, 0)),
        ],
        out_specs=pl.BlockSpec((tile_rows, d), lambda i: (i, 0)),
        compiler_params=pltpu.CompilerParams(
            dimension_semantics=("parallel",),
            vmem_limit_bytes=vmem_limit_bytes,
        ),
    )(x2d, scale2d)

    if rows_padded != rows:
        out2d = out2d[:rows]
    return out2d.reshape(*lead_shape, d)


def rmsnorm_ref(x, scale, *, p=-1.0, eps=1e-8):
    """Pure-JAX reference mirroring the PyTorch forward."""
    d = x.shape[-1]
    if p < 0.0 or p > 1.0:
        d_x = d
        part = x
    else:
        d_x = max(1, int(d * p))
        part = x[..., :d_x]
    norm_x = jnp.sqrt(jnp.sum(part.astype(jnp.float32) ** 2, axis=-1, keepdims=True))
    rms_x = norm_x * (float(d_x) ** -0.5)
    x_normed = x.astype(jnp.float32) / (rms_x + eps)
    return (scale.astype(jnp.float32) * x_normed).astype(x.dtype)


if __name__ == "__main__":
    key = jax.random.PRNGKey(0)
    batch, seq, hidden = 2, 8, 32

    x = jax.random.normal(key, (batch, seq, hidden), dtype=jnp.float32)
    # deterministic parameter init (matches nn.Parameter(torch.ones(d)))
    scale = jnp.ones((hidden,), dtype=jnp.float32)
    # TODO(synk): bias=True variant (offset param) not exercised here; default module has bias=False.

    # default (full-dim) RMSNorm
    out = jax.block_until_ready(rmsnorm_pallas(x, scale, p=-1.0, eps=1e-8))
    ref = rmsnorm_ref(x, scale, p=-1.0, eps=1e-8)
    assert out.shape == x.shape and out.dtype == x.dtype
    assert jnp.allclose(out, ref, atol=1e-5, rtol=1e-5), "mismatch vs reference (full)"

    # partial RMSNorm (masked reduction) + row count not divisible by 8 (padding path)
    x2 = jax.random.normal(jax.random.PRNGKey(1), (3, 5, hidden), dtype=jnp.float32)
    out2 = jax.block_until_ready(rmsnorm_pallas(x2, scale, p=0.5, eps=1e-8))
    ref2 = rmsnorm_ref(x2, scale, p=0.5, eps=1e-8)
    assert out2.shape == x2.shape and out2.dtype == x2.dtype
    assert jnp.allclose(out2, ref2, atol=1e-5, rtol=1e-5), "mismatch vs reference (partial)"

    print("KERNEL_OK")
</pallas_src>

<mosaic_0001>
module attributes {stable_mosaic.version = 11 : i64} {
  func.func @_rmsnorm_kernel(%arg0: i32, %arg1: memref<8x32xf32, #tpu.memory_space<vmem>>, %arg2: memref<1x32xf32, #tpu.memory_space<vmem>>, %arg3: memref<8x32xf32, #tpu.memory_space<vmem>>) attributes {dimension_semantics = [#tpu.dimension_semantics<parallel>], iteration_bounds = array<i64: 2>, scalar_prefetch = 0 : i64, scratch_operands = 0 : i64, tpu.core_type = #tpu.core_type<tc>, window_params = [{transform_indices = @transform_0, window_bounds = array<i64: 8, 32>}, {pipeline_mode = #tpu.pipeline_mode<synchronous>, transform_indices = @transform_1, window_bounds = array<i64: 1, 32>}, {transform_indices = @transform_2, window_bounds = array<i64: 8, 32>}]} {
    %c0 = arith.constant 0 : index
    %c0_0 = arith.constant 0 : index
    %0 = vector.load %arg1[%c0, %c0_0] : memref<8x32xf32, #tpu.memory_space<vmem>>, vector<8x32xf32>
    %1 = arith.mulf %0, %0 : vector<8x32xf32>
    %cst = arith.constant dense<0.000000e+00> : vector<8xf32>
    %2 = vector.multi_reduction <add>, %1, %cst [1] : vector<8x32xf32> to vector<8xf32>
    %3 = vector.shape_cast %2 : vector<8xf32> to vector<8x1xf32>
    %4 = math.sqrt %3 : vector<8x1xf32>
    %cst_1 = arith.constant 0.176776692 : f32
    %5 = vector.broadcast %cst_1 : f32 to vector<8x1xf32>
    %6 = arith.mulf %4, %5 : vector<8x1xf32>
    %cst_2 = arith.constant 9.99999993E-9 : f32
    %7 = vector.broadcast %cst_2 : f32 to vector<8x1xf32>
    %8 = arith.addf %6, %7 : vector<8x1xf32>
    %9 = tpu.reciprocal %8 {approx = true} : vector<8x1xf32> -> vector<8x1xf32>
    %10 = arith.mulf %8, %9 : vector<8x1xf32>
    %cst_3 = arith.constant 2.000000e+00 : f32
    %11 = vector.broadcast %cst_3 : f32 to vector<8x1xf32>
    %12 = arith.subf %11, %10 : vector<8x1xf32>
    %13 = arith.mulf %9, %12 : vector<8x1xf32>
    %c0_4 = arith.constant 0 : index
    %c0_5 = arith.constant 0 : index
    %14 = vector.load %arg2[%c0_4, %c0_5] : memref<1x32xf32, #tpu.memory_space<vmem>>, vector<1x32xf32>
    %15 = vector.broadcast %13 : vector<8x1xf32> to vector<8x32xf32>
    %16 = arith.mulf %0, %15 : vector<8x32xf32>
    %17 = vector.broadcast %14 : vector<1x32xf32> to vector<8x32xf32>
    %18 = arith.mulf %16, %17 : vector<8x32xf32>
    %c0_6 = arith.constant 0 : index
    %c0_7 = arith.constant 0 : index
    %19 = vector.load %arg3[%c0_6, %c0_7] : memref<8x32xf32, #tpu.memory_space<vmem>>, vector<8x32xf32>
    tpu.vector_store %arg3[%c0_6, %c0_7], %18 {strides = array<i32>} : memref<8x32xf32, #tpu.memory_space<vmem>>, vector<8x32xf32>,
    return
  }
  func.func @transform_0(%arg0: i32) -> (i32, i32) {
    %c0_i32 = arith.constant 0 : i32
    %c0_i32_0 = arith.constant 0 : i32
    return %arg0, %c0_i32 : i32, i32
  }
  func.func @transform_1(%arg0: i32) -> (i32, i32) {
    %c0_i32 = arith.constant 0 : i32
    %c0_i32_0 = arith.constant 0 : i32
    %c0_i32_1 = arith.constant 0 : i32
    return %c0_i32, %c0_i32_0 : i32, i32
  }
  func.func @transform_2(%arg0: i32) -> (i32, i32) {
    %c0_i32 = arith.constant 0 : i32
    %c0_i32_0 = arith.constant 0 : i32
    return %arg0, %c0_i32 : i32, i32
  }
}

</mosaic_0001>

<bundles_post_ra>
// kernel: tpu_custom_call.1
= control target key start
LH: loop header
LB: loop body
LE: loop exit
PB: predicated region body
PF: predicated region fallthrough
CT: control target
= control target key end

     0   :  { %7 = vsyncpa [#allocation3], 0  ;;  %s616_s0 = inlined_call_operand.hbm [shape: f32[16,32], index: 0, kind: input, shape index: {}]   ;;  %s617_s1 = inlined_call_operand.vmem [shape: f32[1,32], index: 1, kind: input, shape index: {}]   ;;  %s618_s2 = inlined_call_operand.hbm [shape: f32[16,32], index: 2, kind: output, shape index: {}]  }
   0x1   :  { %9 = vsyncpa [#allocation3 + $0x1], 0 }
   0x2   :  { %10 = vsyncpa [#allocation4], 0 }
   0x3   :  { %12 = vsyncpa [#allocation4 + $0x1], 0  ;;  %s450_s9 = smov 0   ;;  %s452_s10 = smov 0  }
   0x4   :  { %s454_s11 = smov 0   ;;  %s456_s12 = smov 0  }
   0x5 LB: > { %s471_s13 = sadd.s32 4294967295, %s431_s12   ;;  %s272_s14 = sadd.s32 4294967294, %s431_s12   ;;  %s431_s12 = sphi %s456_s12, %s633_s12   ;;  %s427_s11 = sphi %s454_s11, %s632_s11   ;;  %s423_s10 = sphi %s452_s10, %s631_s10   ;;  %s419_s9 = sphi %s450_s9, %s630_s9  }
   0x6   : > { %s475_s15 = sadd.s32 1, %s431_s12   ;;  %s25_s16 = sadd.s32 1, %s427_s11 }
   0x7   : > { %s22_s17 = ssub.s32 %s431_s12, %s475_s15  ;;  %p32_p0 = scmp.ne.s32.totalorder %s427_s11, %s423_s10 }
   0x8   : > { %p23_p1 = scmp.eq.s32.totalorder %s22_s17, 0  ;;  %p33_p2 = scmp.eq.s32.totalorder %s431_s12, 0 }
   0x9   : > { %p38_p3 = scmp.ne.s32.totalorder %s423_s10, %s419_s9  ;;  %p39_p4 = scmp.eq.s32.totalorder %s471_s13, 0 }
   0xa   : > { %s487_s18 = scalar_select %p23_p1, %s427_s11, %s25_s16  }
   0xb   : > { %p489_p5 = por %p33_p2, %p32_p0  ;;  %p493_p6 = por %p39_p4, %p38_p3 }
   0xc   : > { %p83_p7 = scmp.eq.s32.totalorder %s471_s13, 1  ;;  %p89_p8 = scmp.eq.s32.totalorder %s272_s14, 1 }
   0xd   : > { %p297_p10 = scmp.lt.s32.totalorder %s431_s12, 2  ;;  %s112_s23 = sand.u32 1, %s427_s11  }
   0xe   : > { %p500_p11 = por %p83_p7, %p32_p0  ;;  %p504_p12 = por %p89_p8, %p38_p3 }
   0xf   : > { %s276_s24 = sshll.u32 %s431_s12, 7  ;;  %s275_s25 = sshll.u32 %s112_s23, 3 }
  0x10   : > { %s622_s21 = scalar_select %p500_p11, 1, 0 }
  0x11   : > { %s623_s22 = scalar_select %p504_p12, 1, 0 }
  0x12   : > { %s513_s28 = scalar_lea.hbm %s616_s0, %s276_s24  ;;  %s116_s29 = scalar_lea.vmem [#allocation2], %s275_s25 }
  0x13   : > { %s123_s30 = sshll.u32 %s116_s29, 4  ;;  %p517_p13 = pnand %p297_p10, %p489_p5  ;;  %s521_s30 = int_to_ptr.vmem [resolvable:$true] %s123_s30 }
  0x14   : > { %s113_s4 = scalar_lea.sflag [#allocation3], %s112_s23  ;;  %s335_s5 = scalar_lea.hbm %s513_s28, 128 }
  0x15   : > { %p336_p2 = scmp.ne.s32.totalorder %s513_s28, %s335_s5  ;;  %p337_p3 = pneg %p517_p13 }
  0x16   : > { %s340_s8 = scalar_lea.hbm %s616_s0, 256  ;;  %p341_p5 = scmp.lt.u32.totalorder %s513_s28, %s616_s0 }
  0x17   : > { %p338_p4 = pnand %p337_p3, %p336_p2  ;;  %p342_p8 = scmp.lt.u32.totalorder %s340_s8, %s335_s5 }
  0x18   : > { %p344_p9 = scmp.lt.u32.totalorder %s335_s5, %s513_s28 }
  0x19   : > { %p339_p7 = pneg %p338_p4  ;;  %p343_p10 = por %p342_p8, %p341_p5 }
  0x1b   : > { %p345_p0 = por %p344_p9, %p343_p10 }
  0x1d   : > { %p346_p1 = pnand %p345_p0, %p339_p7 }
  0x1f   : > { %349 = shalt.err (!%p346_p1)
}
  0x20   : > { %s350_s17 = scalar_lea.vmem %s521_s30, 128  ;;  %s433_s19 = smov [#allocation2]  }
  0x21   : > { %p351_p2 = scmp.ne.s32.totalorder %s521_s30, %s350_s17  ;;  %s355_s23 = sshll.u32 %s433_s19, 4  ;;  %s356_s23 = int_to_ptr.vmem [resolvable:$false] %s355_s23 }
  0x22   : > { %s357_s24 = scalar_lea.vmem %s356_s23, 256  ;;  %p358_p11 = scmp.lt.s32.totalorder %s521_s30, %s356_s23 }
  0x23   : > { %p353_p4 = pnand %p351_p2, %p337_p3  ;;  %p359_p5 = scmp.lt.s32.totalorder %s357_s24, %s350_s17 }
  0x25   : > { %p354_p12 = pneg %p353_p4  ;;  %p360_p8 = por %p359_p5, %p358_p11 }
  0x27   : > { %p361_p9 = pnand %p360_p8, %p354_p12 }
  0x29   : > { %364 = shalt.err (!%p361_p9)
}
  0x2a   : > { %292 = dma.hbm_to_vmem [thread:$0]  (!%p517_p13), %s513_s28, 128, %s521_s30, %s113_s4  }
  0x2b   : > { %p625_p0 = scmp.lt.s32.totalorder %s431_s12, 3  ;;  %p626_p1 = scmp.ge.s32.totalorder %s431_s12, 1 }
  0x2d   : > { %p129_p3 = pnand %p626_p1, %p625_p0 }
  0x2e   : > { %s555_s25 = sand.u32 (!%p129_p3), 1, %s423_s10  }
  0x2f   : > { %132 = sbr.rel (%p129_p3) target bundleno = 255 (0xff), region = 28  ;;  %s278_s26 = sshll.u32 (!%p129_p3), %s555_s25, 3 }
  0x30   : > { %s135_s27 = scalar_lea.sflag (!%p129_p3), [#allocation3], %s555_s25  ;;  %s138_s29 = scalar_lea.vmem (!%p129_p3), [#allocation2], %s278_s26 }
  0x36   : > { %410 = dma.done.wait (%p493_p6), %s135_s27, 128  }
  0x37   : > { %412 = vsyncadd (%p493_p6), %s135_s27, 4294967168  ;;  %v159_v0 = vld [vmem:[%s138_s29] sm:$0xff]  ;;  %vm161_vm0 = vcmask 261120   ;;  %s282_s30 = sshll.u32 %s471_s13, 7  ;;  %s158_s3 = scalar_lea.vmem [#allocation5], %s278_s26 }
  0x38   : > { %v160_v1 = vmul.f32 %v159_v0, %v159_v0  ;;  %v280_v15 = vld [vmem:[%s617_s1] ss:$0 sm:$0xff]  ;;  %s202_s4 = sshll.u32 %s158_s3, 4  ;;  %s571_s7 = scalar_lea.hbm %s618_s2, %s282_s30  ;;  %s573_s4 = int_to_ptr.vmem [resolvable:$true] %s202_s4 }
  0x39   : > { %s189_s8 = scalar_lea.sflag [#allocation4], %s555_s25  ;;  %s365_s14 = scalar_lea.vmem %s573_s4, 128 }
  0x3a   : > { %v162_v2 = vsel %vm161_vm0, %v160_v1, 0.0  ;;  %p366_p6 = scmp.ne.s32.totalorder %s573_s4, %s365_s14  ;;  %p627_p11 = scmp.ne.s32.totalorder %s622_s21, 0 }
  0x3b   : > { %163 = vadd.xlane.f32.xlu0 %v162_v2  ;;  %s434_s13 = smov [#allocation5]  }
  0x3c   : > { %p367_p12 = pnand %p366_p6, %p627_p11  ;;  %s369_s16 = sshll.u32 %s434_s13, 4  ;;  %s370_s16 = int_to_ptr.vmem [resolvable:$false] %s369_s16 }
  0x3d   : > { %s371_s17 = scalar_lea.vmem %s370_s16, 256  ;;  %p372_p7 = scmp.lt.s32.totalorder %s573_s4, %s370_s16 }
  0x3e   : > { %p368_p13 = pneg %p367_p12  ;;  %p373_p10 = scmp.lt.s32.totalorder %s371_s17, %s365_s14 }
  0x40   : > { %p374_p2 = por %p373_p10, %p372_p7 }
  0x42   : > { %p375_p4 = pnand %p374_p2, %p368_p13 }
  0xc8   : > { %v164_v3 = vpop.xlane.xlu0 %163 }
  0xc9   : > { %331 = vrsqrt.f32 %v164_v3  ;;  %vm167_vm1 = vcmp.eq.f32.partialorder %v164_v3, inf  ;;  %v170_v6 = vand.u32 2147483648, %v164_v3  ;;  %vm169_vm2 = vcmp.eq.f32.partialorder %v164_v3, 0.0 }
  0xd3   : > { %v332_v4 = vpop.eup %331 }
  0xd4   : > { %v166_v5 = vmul.f32 %v332_v4, %v164_v3 }
  0xd6   : > { %v168_v7 = vsel %vm167_vm1, %v164_v3, %v166_v5 }
  0xd7   : > { %v171_v8 = vsel %vm169_vm2, %v170_v6, %v168_v7 }
  0xd8   : > { %v172_v9 = vmul.f32 0.17677669, %v171_v8 }
  0xda   : > { %v173_v10 = vadd.f32 1e-08, %v172_v9 }
  0xdc   : > { %333 = vrcp.f32 %v173_v10 }
  0xe6   : > { %v334_v11 = vpop.eup %333 }
  0xe7   : > { %v175_v12 = vmul.f32 %v334_v11, %v173_v10 }
  0xe9   : > { %v176_v13 = vsub.f32 2.0, %v175_v12 }
  0xeb   : > { %v177_v14 = vmul.f32 %v334_v11, %v176_v13 }
  0xed   : > { %v179_v16 = vmul.f32 %v177_v14, %v159_v0 }
  0xef   : > { %v186_v17 = vmul.f32 %v280_v15, %v179_v16 }
  0xf1   : > { %187 = vst.msk [vmem:[%s158_s3] sm:$0xff] %vm161_vm0, %v186_v17 }
  0xf2   : > { %378 = shalt.err (!%p375_p4)
}
  0xf3   : > { %s379_s19 = scalar_lea.hbm %s571_s7, 128  ;;  %s383_s25 = scalar_lea.hbm %s618_s2, 256 }
  0xf4   : > { %p380_p5 = scmp.ne.s32.totalorder %s571_s7, %s379_s19  ;;  %p384_p0 = scmp.lt.u32.totalorder %s571_s7, %s618_s2 }
  0xf5   : > { %p385_p1 = scmp.lt.u32.totalorder %s383_s25, %s379_s19  ;;  %p387_p6 = scmp.lt.u32.totalorder %s379_s19, %s571_s7 }
  0xf6   : > { %p381_p8 = pnand %p380_p5, %p627_p11 }
  0xf7   : > { %p386_p3 = por %p385_p1, %p384_p0 }
  0xf8   : > { %p382_p9 = pneg %p381_p8 }
  0xf9   : > { %p388_p12 = por %p387_p6, %p386_p3 }
  0xfb   : > { %p389_p13 = pnand %p388_p12, %p382_p9 }
  0xfd   : > { %392 = shalt.err (!%p389_p13)
}
  0xfe   : > { %287 = dma.vmem_to_hbm [thread:$0]  (%p627_p11), %s573_s4, 128, %s571_s7, %s189_s8  }
  0xff PF: > { %s214_s29 = sand.u32 1, %s419_s9   ;;  %p628_p7 = scmp.ne.s32.totalorder %s623_s22, 0 }
 0x100   : > { %p629_p10 = scmp.ge.s32.totalorder %s431_s12, 2  ;;  %s215_s20 = scalar_lea.sflag [#allocation4], %s214_s29 }
 0x102   : > { %p294_p2 = pnand %p629_p10, %p628_p7 }
 0x104   : > { %414 = dma.done.wait (!%p294_p2), %s215_s20, 128  }
 0x105   : > { %416 = vsyncadd (!%p294_p2), %s215_s20, 4294967168  ;;  %p15_p4 = scmp.ge.s32.totalorder %s475_s15, 4   ;;  %s630_s9 = smov %s423_s10 }
 0x106   : > { %s631_s10 = smov %s427_s11  ;;  %s632_s11 = smov %s487_s18 }
 0x107   : > { %s633_s12 = smov %s475_s15  ;;  %17 = sbr.rel (!%p15_p4) target bundleno = 5 (0x5), region = 73 }
 0x10e   :  { %220 = vsyncpa [#allocation3], 1 }
 0x10f   :  { %222 = vsyncpa [#allocation3 + $0x1], 1 }
 0x110   :  { %223 = vsyncpa [#allocation4], 1 }
 0x111   :  { %225 = vsyncpa [#allocation4 + $0x1], 1 }

</bundles_post_ra>
